<compile_context>
chip_gen: v5e
topology: v5e:2x2
jax: 0.10.0
libtpu: 0.0.40
codegen_flags: <defaults>
</compile_context>

<pallas_src>
import jax
import jax.numpy as jnp
from jax.experimental import pallas as pl
from jax.experimental.pallas import tpu as pltpu

IN_DIM = 3
K_PAD = 8          # layer-1 contraction padded to the f32 sublane tile
HID = 128
OUT_DIM = 1
OUT_PAD = 8        # layer-3 output rows padded to the f32 sublane tile


def _silu(h):
    # x * sigmoid(x) with a single-EUP, numerically stable tanh lowering.
    return h * (0.5 * jnp.tanh(0.5 * h) + 0.5)


def _critic_kernel(x_ref, w1_ref, b1_ref, w2_ref, b2_ref, w3_ref, b3_ref, o_ref):
    # x_ref: (K_PAD, tm) f32, batch on the lane axis (rows 3..7 are zero).
    x = x_ref[...]

    # ---- layer 1 on the MXU: (128, 8) x (8, tm) -> (128, tm) f32 ----
    h1 = jnp.dot(w1_ref[...], x, preferred_element_type=jnp.float32) + b1_ref[...]
    h1 = _silu(h1)                                                   # f32 (v5e-safe)

    # ---- layer 2 on the MXU: (128, 128) x (128, tm) -> (128, tm) f32 ----
    h2 = jnp.dot(w2_ref[...], h1, preferred_element_type=jnp.float32) + b2_ref[...]
    h2 = _silu(h2)

    # ---- layer 3 on the MXU: (8, 128) x (128, tm) -> (8, tm); row 0 is real ----
    out8 = jnp.dot(w3_ref[...], h2, preferred_element_type=jnp.float32)
    o_ref[...] = (out8[0:1, :] + b3_ref[0]).astype(o_ref.dtype)      # (1, tm)


def _round_up(n, m):
    return ((n + m - 1) // m) * m


def critic_forward(x, params, *, tm=2048):
    """x: [B, 3] float32 -> [B, 1] float32."""
    w1, b1, w2, b2, w3, b3 = params
    B = x.shape[0]

    # Batch tile: lane-dense (multiple of 128), large enough to amortize the
    # per-step overhead, but keep >=2 grid steps when B spans >=2 lane tiles
    # so both v7x TensorCores get work on the "parallel" batch axis.
    B128 = _round_up(max(B, 1), 128)
    cap = max(128, (B128 // 2) // 128 * 128) if B128 >= 256 else 128
    tm = max(128, min((tm // 128) * 128, cap))
    B_pad = _round_up(B, tm)

    # Pad batch rows to B_pad and the 3 features to K_PAD, then put the batch
    # on the lane axis.  (Stays in the wrapper -> fuses into one cheap XLA op.)
    x_pad = jnp.pad(x, ((0, B_pad - B), (0, K_PAD - IN_DIM)))
    x_t = jnp.transpose(x_pad)                          # (K_PAD, B_pad) f32

    # Reorient params once, outside the kernel (all f32; MXU slack is huge).
    w1_t = jnp.pad(w1.T, ((0, 0), (0, K_PAD - IN_DIM)))    # (128, 8), zero K-pad
    b1_c = b1.reshape(HID, 1)                               # (128, 1)
    w2_t = w2.T                                             # (128, 128) (out, in)
    b2_c = b2.reshape(HID, 1)                               # (128, 1)
    w3_r = jnp.pad(w3.T, ((0, OUT_PAD - OUT_DIM), (0, 0)))  # (8, 128), zero row-pad
    b3_s = b3.reshape(OUT_DIM)                              # (1,) scalar -> SMEM

    grid = (B_pad // tm,)
    full = lambda shape: pl.BlockSpec(shape, lambda i: (0, 0))

    out = pl.pallas_call(
        _critic_kernel,
        out_shape=jax.ShapeDtypeStruct((1, B_pad), jnp.float32),
        grid_spec=pltpu.PrefetchScalarGridSpec(
            num_scalar_prefetch=0,
            grid=grid,
            in_specs=[
                pl.BlockSpec((K_PAD, tm), lambda i: (0, i)),         # x^T tile
                full((HID, K_PAD)),                                  # w1^T (padded)
                full((HID, 1)),                                      # b1
                full((HID, HID)),                                    # w2^T
                full((HID, 1)),                                      # b2
                full((OUT_PAD, HID)),                                # w3 row (padded)
                pl.BlockSpec(memory_space=pltpu.MemorySpace.SMEM),   # b3 scalar
            ],
            out_specs=pl.BlockSpec((1, tm), lambda i: (0, i)),       # lane-dense out
        ),
        compiler_params=pltpu.CompilerParams(
            dimension_semantics=("parallel",),
        ),
    )(x_t, w1_t, b1_c, w2_t, b2_c, w3_r, b3_s)

    return out.reshape(B_pad, OUT_DIM)[:B]


def init_params(key):
    """Deterministic init mimicking PyTorch nn.Linear default (U[-1/sqrt(fan_in), ...])."""
    ks = jax.random.split(key, 6)

    def linear(kw, kb, fan_in, fan_out):
        bound = 1.0 / jnp.sqrt(fan_in)
        w = jax.random.uniform(kw, (fan_in, fan_out), jnp.float32, -bound, bound)
        b = jax.random.uniform(kb, (1, fan_out), jnp.float32, -bound, bound)
        return w, b

    w1, b1 = linear(ks[0], ks[1], IN_DIM, HID)
    w2, b2 = linear(ks[2], ks[3], HID, HID)
    w3, b3 = linear(ks[4], ks[5], HID, OUT_DIM)
    return (w1, b1, w2, b2, w3, b3)


def _reference(x, params):
    w1, b1, w2, b2, w3, b3 = params
    h1 = jax.nn.silu(x @ w1 + b1)
    h2 = jax.nn.silu(h1 @ w2 + b2)
    return h2 @ w3 + b3


if __name__ == "__main__":
    key = jax.random.PRNGKey(0)
    kx, kp = jax.random.split(key)
    params = init_params(kp)

    fwd = jax.jit(critic_forward)   # fuses the pad/transpose with the kernel call

    # Small smoke test (padded up to one 128-lane tile, grid of 1).
    x_small = jax.random.normal(kx, (8, IN_DIM), dtype=jnp.float32)
    out_small = jax.block_until_ready(fwd(x_small, params))
    ref_small = _reference(x_small, params)
    assert out_small.shape == (8, OUT_DIM)
    # MXU default-precision matmuls vs pure-f32 reference -> loose tolerance.
    assert jnp.allclose(out_small, ref_small, atol=5e-2, rtol=5e-2), "mismatch (small)"

    # Multi-tile + padding path (B=300 -> tm clamps to 128, grid of 3, pad to 384).
    x_big = jax.random.normal(kx, (300, IN_DIM), dtype=jnp.float32)
    out_big = jax.block_until_ready(fwd(x_big, params))
    ref_big = _reference(x_big, params)
    assert out_big.shape == (300, OUT_DIM)
    assert jnp.allclose(out_big, ref_big, atol=5e-2, rtol=5e-2), "mismatch (multi-tile)"

    print("KERNEL_OK")
</pallas_src>

<mosaic_0001>
module attributes {stable_mosaic.version = 11 : i64} {
  func.func @_critic_kernel(%arg0: i32, %arg1: memref<8x128xf32, #tpu.memory_space<vmem>>, %arg2: memref<128x8xf32, #tpu.memory_space<vmem>>, %arg3: memref<128x1xf32, #tpu.memory_space<vmem>>, %arg4: memref<128x128xf32, #tpu.memory_space<vmem>>, %arg5: memref<128x1xf32, #tpu.memory_space<vmem>>, %arg6: memref<8x128xf32, #tpu.memory_space<vmem>>, %arg7: memref<1xf32, #tpu.memory_space<smem>>, %arg8: memref<1x128xf32, #tpu.memory_space<vmem>>) attributes {dimension_semantics = [#tpu.dimension_semantics<parallel>], iteration_bounds = array<i64: 1>, scalar_prefetch = 0 : i64, scratch_operands = 0 : i64, tpu.core_type = #tpu.core_type<tc>, window_params = [{transform_indices = @transform_0, window_bounds = array<i64: 8, 128>}, {pipeline_mode = #tpu.pipeline_mode<synchronous>, transform_indices = @transform_1, window_bounds = array<i64: 128, 8>}, {pipeline_mode = #tpu.pipeline_mode<synchronous>, transform_indices = @transform_2, window_bounds = array<i64: 128, 1>}, {pipeline_mode = #tpu.pipeline_mode<synchronous>, transform_indices = @transform_3, window_bounds = array<i64: 128, 128>}, {pipeline_mode = #tpu.pipeline_mode<synchronous>, transform_indices = @transform_4, window_bounds = array<i64: 128, 1>}, {pipeline_mode = #tpu.pipeline_mode<synchronous>, transform_indices = @transform_5, window_bounds = array<i64: 8, 128>}, {transform_indices = @transform_6, window_bounds = array<i64: 1>}, {transform_indices = @transform_7, window_bounds = array<i64: 1, 128>}]} {
    %c0 = arith.constant 0 : index
    %c0_0 = arith.constant 0 : index
    %0 = vector.load %arg1[%c0, %c0_0] : memref<8x128xf32, #tpu.memory_space<vmem>>, vector<8x128xf32>
    %c0_1 = arith.constant 0 : index
    %c0_2 = arith.constant 0 : index
    %1 = vector.load %arg2[%c0_1, %c0_2] : memref<128x8xf32, #tpu.memory_space<vmem>>, vector<128x8xf32>
    %cst = arith.constant dense<0.000000e+00> : vector<128x128xf32>
    %2 = tpu.matmul %1, %0, %cst {dimension_numbers = #tpu.dot_dimension_numbers<[1], [0], [0], [1], [0, 0, 1, 1], [], []>} : vector<128x8xf32>, vector<8x128xf32>, vector<128x128xf32> -> vector<128x128xf32>
    %c0_3 = arith.constant 0 : index
    %c0_4 = arith.constant 0 : index
    %3 = vector.load %arg3[%c0_3, %c0_4] : memref<128x1xf32, #tpu.memory_space<vmem>>, vector<128x1xf32>
    %4 = vector.broadcast %3 : vector<128x1xf32> to vector<128x128xf32>
    %5 = arith.addf %2, %4 : vector<128x128xf32>
    %cst_5 = arith.constant 5.000000e-01 : f32
    %6 = vector.broadcast %cst_5 : f32 to vector<128x128xf32>
    %7 = arith.mulf %6, %5 : vector<128x128xf32>
    %8 = math.tanh %7 : vector<128x128xf32>
    %cst_6 = arith.constant 5.000000e-01 : f32
    %9 = vector.broadcast %cst_6 : f32 to vector<128x128xf32>
    %10 = arith.mulf %9, %8 : vector<128x128xf32>
    %cst_7 = arith.constant 5.000000e-01 : f32
    %11 = vector.broadcast %cst_7 : f32 to vector<128x128xf32>
    %12 = arith.addf %10, %11 : vector<128x128xf32>
    %13 = arith.mulf %5, %12 : vector<128x128xf32>
    %c0_8 = arith.constant 0 : index
    %c0_9 = arith.constant 0 : index
    %14 = vector.load %arg4[%c0_8, %c0_9] : memref<128x128xf32, #tpu.memory_space<vmem>>, vector<128x128xf32>
    %cst_10 = arith.constant dense<0.000000e+00> : vector<128x128xf32>
    %15 = tpu.matmul %14, %13, %cst_10 {dimension_numbers = #tpu.dot_dimension_numbers<[1], [0], [0], [1], [0, 0, 1, 1], [], []>} : vector<128x128xf32>, vector<128x128xf32>, vector<128x128xf32> -> vector<128x128xf32>
    %c0_11 = arith.constant 0 : index
    %c0_12 = arith.constant 0 : index
    %16 = vector.load %arg5[%c0_11, %c0_12] : memref<128x1xf32, #tpu.memory_space<vmem>>, vector<128x1xf32>
    %17 = vector.broadcast %16 : vector<128x1xf32> to vector<128x128xf32>
    %18 = arith.addf %15, %17 : vector<128x128xf32>
    %cst_13 = arith.constant 5.000000e-01 : f32
    %19 = vector.broadcast %cst_13 : f32 to vector<128x128xf32>
    %20 = arith.mulf %19, %18 : vector<128x128xf32>
    %21 = math.tanh %20 : vector<128x128xf32>
    %cst_14 = arith.constant 5.000000e-01 : f32
    %22 = vector.broadcast %cst_14 : f32 to vector<128x128xf32>
    %23 = arith.mulf %22, %21 : vector<128x128xf32>
    %cst_15 = arith.constant 5.000000e-01 : f32
    %24 = vector.broadcast %cst_15 : f32 to vector<128x128xf32>
    %25 = arith.addf %23, %24 : vector<128x128xf32>
    %26 = arith.mulf %18, %25 : vector<128x128xf32>
    %c0_16 = arith.constant 0 : index
    %c0_17 = arith.constant 0 : index
    %27 = vector.load %arg6[%c0_16, %c0_17] : memref<8x128xf32, #tpu.memory_space<vmem>>, vector<8x128xf32>
    %cst_18 = arith.constant dense<0.000000e+00> : vector<8x128xf32>
    %28 = tpu.matmul %27, %26, %cst_18 {dimension_numbers = #tpu.dot_dimension_numbers<[1], [0], [0], [1], [0, 0, 1, 1], [], []>} : vector<8x128xf32>, vector<128x128xf32>, vector<8x128xf32> -> vector<8x128xf32>
    %29 = vector.extract_strided_slice %28 {offsets = [0, 0], sizes = [1, 128], strides = [1, 1]} : vector<8x128xf32> to vector<1x128xf32>
    %c0_19 = arith.constant 0 : index
    %30 = memref.load %arg7[%c0_19] : memref<1xf32, #tpu.memory_space<smem>>
    %31 = vector.broadcast %30 : f32 to vector<1x128xf32>
    %32 = arith.addf %29, %31 : vector<1x128xf32>
    %c0_20 = arith.constant 0 : index
    %c0_21 = arith.constant 0 : index
    %33 = vector.load %arg8[%c0_20, %c0_21] : memref<1x128xf32, #tpu.memory_space<vmem>>, vector<1x128xf32>
    tpu.vector_store %arg8[%c0_20, %c0_21], %32 {strides = array<i32>} : memref<1x128xf32, #tpu.memory_space<vmem>>, vector<1x128xf32>,
    return
  }
  func.func @transform_0(%arg0: i32) -> (i32, i32) {
    %c0_i32 = arith.constant 0 : i32
    %c0_i32_0 = arith.constant 0 : i32
    return %c0_i32, %arg0 : i32, i32
  }
  func.func @transform_1(%arg0: i32) -> (i32, i32) {
    %c0_i32 = arith.constant 0 : i32
    %c0_i32_0 = arith.constant 0 : i32
    %c0_i32_1 = arith.constant 0 : i32
    return %c0_i32, %c0_i32_0 : i32, i32
  }
  func.func @transform_2(%arg0: i32) -> (i32, i32) {
    %c0_i32 = arith.constant 0 : i32
    %c0_i32_0 = arith.constant 0 : i32
    %c0_i32_1 = arith.constant 0 : i32
    return %c0_i32, %c0_i32_0 : i32, i32
  }
  func.func @transform_3(%arg0: i32) -> (i32, i32) {
    %c0_i32 = arith.constant 0 : i32
    %c0_i32_0 = arith.constant 0 : i32
    %c0_i32_1 = arith.constant 0 : i32
    return %c0_i32, %c0_i32_0 : i32, i32
  }
  func.func @transform_4(%arg0: i32) -> (i32, i32) {
    %c0_i32 = arith.constant 0 : i32
    %c0_i32_0 = arith.constant 0 : i32
    %c0_i32_1 = arith.constant 0 : i32
    return %c0_i32, %c0_i32_0 : i32, i32
  }
  func.func @transform_5(%arg0: i32) -> (i32, i32) {
    %c0_i32 = arith.constant 0 : i32
    %c0_i32_0 = arith.constant 0 : i32
    %c0_i32_1 = arith.constant 0 : i32
    return %c0_i32, %c0_i32_0 : i32, i32
  }
  func.func @transform_6(%arg0: i32) -> i32 {
    %c0_i32 = arith.constant 0 : i32
    %c0_i32_0 = arith.constant 0 : i32
    return %c0_i32 : i32
  }
  func.func @transform_7(%arg0: i32) -> (i32, i32) {
    %c0_i32 = arith.constant 0 : i32
    %c0_i32_0 = arith.constant 0 : i32
    return %c0_i32, %arg0 : i32, i32
  }
}

</mosaic_0001>

<bundles_post_ra>
// kernel: critic_forward.1
= control target key start
LH: loop header
LB: loop body
LE: loop exit
PB: predicated region body
PF: predicated region fallthrough
CT: control target
= control target key end

     0   :  { %v721_v0 = vmov 0   ;;  %vm140_vm0 = vcmask 64512   ;;  %s1097_s2 = inlined_call_operand.vmem [shape: f32[128,1], index: 2, kind: input, shape index: {}]   ;;  %s1098_s0 = inlined_call_operand.vmem [shape: f32[8,128], index: 0, kind: input, shape index: {}]   ;;  %s1099_s1 = inlined_call_operand.vmem [shape: f32[128,8], index: 1, kind: input, shape index: {}]   ;;  %s1100_s4 = inlined_call_operand.vmem [shape: f32[128,1], index: 4, kind: input, shape index: {}]   ;;  %s1101_s3 = inlined_call_operand.vmem [shape: f32[128,128], index: 3, kind: input, shape index: {}]   ;;  %s1102_s5 = inlined_call_operand.vmem [shape: f32[8,128], index: 5, kind: input, shape index: {}]   ;;  %s1103_s6 = inlined_call_operand.<no memory space> [shape: f32[1], index: 6, kind: input, shape index: {}]   ;;  %s1104_s7 = inlined_call_operand.vmem [shape: f32[1,128], index: 7, kind: output, shape index: {}]  }
   0x1   :  { %655 = vset.pattern.permute.xlu1 %v721_v0  ;;  %654 = vset.pattern.permute.xlu0 %v721_v0  ;;  %v59_v1 = vld [vmem:[%s1097_s2 + $0x78] sm:$0xff]  ;;  %v57_v2 = vld [vmem:[%s1097_s2 + $0x68] sm:$0xff]  ;;  %v27_v3 = vld [vmem:[%s1098_s0] sm:$0xff] }
   0x2   :  { %137 = vperm.xlu0 %654, %v59_v1   ;;  %127 = vperm.xlu1 %655, %v57_v2   ;;  %v28_v4 = vld [vmem:[%s1099_s1] sm:$0xff]  ;;  %v39_v5 = vld [vmem:[%s1099_s1 + $0x58] sm:$0xff]  ;;  %v58_v7 = vld [vmem:[%s1097_s2 + $0x70] sm:$0xff] }
   0x3   :  { %204 = vmatpush.msra.mxu0 %v27_v3  ;;  %636 = vmatpush.msra.mxu2 %v27_v3  ;;  %v55_v6 = vld [vmem:[%s1097_s2 + $0x58] sm:$0xff]  ;;  %v56_v8 = vld [vmem:[%s1097_s2 + $0x60] sm:$0xff]  ;;  %v29_v9 = vld [vmem:[%s1099_s1 + $0x8] sm:$0xff] }
   0x4   :  { %620 = vmatmul.msk.f32.vlgmr.msra.gmra.mxu0 %vm140_vm0, %v28_v4  ;;  %631 = vmatmul.msk.f32.vlgmr.msra.gmra.mxu2 %vm140_vm0, %v39_v5  ;;  %v40_v10 = vld [vmem:[%s1099_s1 + $0x60] sm:$0xff]  ;;  %v54_v11 = vld [vmem:[%s1097_s2 + $0x50] sm:$0xff]  ;;  %v53_v12 = vld [vmem:[%s1097_s2 + $0x48] sm:$0xff] }
   0x5   :  { %656 = vset.pattern.permute.xlu2 %v721_v0  ;;  %v52_v13 = vld [vmem:[%s1097_s2 + $0x40] sm:$0xff]  ;;  %v30_v14 = vld [vmem:[%s1099_s1 + $0x10] sm:$0xff]  ;;  %v41_v15 = vld [vmem:[%s1099_s1 + $0x68] sm:$0xff] }
   0x6   :  { %117 = vperm.xlu2 %656, %v55_v6   ;;  %v51_v16 = vld [vmem:[%s1097_s2 + $0x38] sm:$0xff]  ;;  %v50_v17 = vld [vmem:[%s1097_s2 + $0x30] sm:$0xff]  ;;  %v49_v18 = vld [vmem:[%s1097_s2 + $0x28] sm:$0xff] }
   0x7   :  { %v31_v19 = vld [vmem:[%s1099_s1 + $0x18] sm:$0xff]  ;;  %v42_v20 = vld [vmem:[%s1099_s1 + $0x70] sm:$0xff]  ;;  %v48_v21 = vld [vmem:[%s1097_s2 + $0x20] sm:$0xff] }
   0x8   :  { %v47_v22 = vld [vmem:[%s1097_s2 + $0x18] sm:$0xff]  ;;  %v46_v23 = vld [vmem:[%s1097_s2 + $0x10] sm:$0xff]  ;;  %v32_v24 = vld [vmem:[%s1099_s1 + $0x20] sm:$0xff] }
   0x9   :  { %v43_v25 = vld [vmem:[%s1099_s1 + $0x78] sm:$0xff]  ;;  %v45_v26 = vld [vmem:[%s1097_s2 + $0x8] sm:$0xff]  ;;  %v44_v28 = vld [vmem:[%s1097_s2] sm:$0xff] }
   0xa   :  { %132 = vperm.xlu0 %654, %v58_v7   ;;  %122 = vperm.xlu1 %655, %v56_v8   ;;  %v365_v27 = vld [vmem:[%s1100_s4 + $0x78] sm:$0xff]  ;;  %v33_v29 = vld [vmem:[%s1099_s1 + $0x28] sm:$0xff]  ;;  %v364_v30 = vld [vmem:[%s1100_s4 + $0x70] sm:$0xff] }
   0xb   :  { %v362_v31 = vld [vmem:[%s1100_s4 + $0x60] sm:$0xff]  ;;  %v363_v32 = vld [vmem:[%s1100_s4 + $0x68] sm:$0xff]  ;;  %v34_v33 = vld [vmem:[%s1099_s1 + $0x30] sm:$0xff] }
   0xc   :  { %621 = vmatmul.msk.f32.gmra.mxu0 %vm140_vm0, %v29_v9  ;;  %632 = vmatmul.msk.f32.gmra.mxu2 %vm140_vm0, %v40_v10  ;;  %v361_v34 = vld [vmem:[%s1100_s4 + $0x58] sm:$0xff]  ;;  %v359_v35 = vld [vmem:[%s1100_s4 + $0x48] sm:$0xff]  ;;  %v360_v36 = vld [vmem:[%s1100_s4 + $0x50] sm:$0xff] }
   0xd   :  { %v35_v37 = vld [vmem:[%s1099_s1 + $0x38] sm:$0xff]  ;;  %v358_v38 = vld [vmem:[%s1100_s4 + $0x40] sm:$0xff]  ;;  %v356_v39 = vld [vmem:[%s1100_s4 + $0x30] sm:$0xff] }
   0xe   :  { %112 = vperm.xlu2 %656, %v54_v11   ;;  %v357_v40 = vld [vmem:[%s1100_s4 + $0x38] sm:$0xff]  ;;  %v36_v41 = vld [vmem:[%s1099_s1 + $0x40] sm:$0xff]  ;;  %v355_v42 = vld [vmem:[%s1100_s4 + $0x28] sm:$0xff] }
   0xf   :  { %v353_v43 = vld [vmem:[%s1100_s4 + $0x18] sm:$0xff]  ;;  %v354_v44 = vld [vmem:[%s1100_s4 + $0x20] sm:$0xff]  ;;  %v37_v45 = vld [vmem:[%s1099_s1 + $0x48] sm:$0xff] }
  0x10   :  { %v352_v46 = vld [vmem:[%s1100_s4 + $0x10] sm:$0xff]  ;;  %v350_v47 = vld [vmem:[%s1100_s4] sm:$0xff]  ;;  %v351_v48 = vld [vmem:[%s1100_s4 + $0x8] sm:$0xff] }
  0x11   :  { %v38_v49 = vld [vmem:[%s1099_s1 + $0x50] sm:$0xff] }
  0x12   :  { %107 = vperm.xlu0 %654, %v53_v12   ;;  %102 = vperm.xlu1 %655, %v52_v13  }
  0x14   :  { %622 = vmatmul.msk.f32.gmra.mxu0 %vm140_vm0, %v30_v14  ;;  %633 = vmatmul.msk.f32.gmra.mxu2 %vm140_vm0, %v41_v15 }
  0x16   :  { %97 = vperm.xlu2 %656, %v51_v16  }
  0x1a   :  { %92 = vperm.xlu0 %654, %v50_v17   ;;  %87 = vperm.xlu1 %655, %v49_v18  }
  0x1c   :  { %623 = vmatmul.msk.f32.gmra.mxu0 %vm140_vm0, %v31_v19  ;;  %634 = vmatmul.msk.f32.gmra.mxu2 %vm140_vm0, %v42_v20 }
  0x1e   :  { %82 = vperm.xlu2 %656, %v48_v21  }
  0x22   :  { %77 = vperm.xlu0 %654, %v47_v22   ;;  %72 = vperm.xlu1 %655, %v46_v23  }
  0x24   :  { %624 = vmatmul.msk.f32.gmra.mxu0 %vm140_vm0, %v32_v24  ;;  %635 = vmatmul.msk.f32.gmra.mxu2 %vm140_vm0, %v43_v25 }
  0x26   :  { %67 = vperm.xlu2 %656, %v45_v26  }
  0x2a   :  { %443 = vperm.xlu1 %655, %v365_v27   ;;  %62 = vperm.xlu0 %654, %v44_v28  }
  0x2c   :  { %625 = vmatmul.msk.f32.gmra.mxu0 %vm140_vm0, %v33_v29 }
  0x2e   :  { %438 = vperm.xlu2 %656, %v364_v30  }
  0x32   :  { %428 = vperm.xlu1 %655, %v362_v31   ;;  %433 = vperm.xlu0 %654, %v363_v32  }
  0x34   :  { %626 = vmatmul.msk.f32.gmra.mxu0 %vm140_vm0, %v34_v33 }
  0x36   :  { %423 = vperm.xlu2 %656, %v361_v34  }
  0x3a   :  { %413 = vperm.xlu1 %655, %v359_v35   ;;  %418 = vperm.xlu0 %654, %v360_v36  }
  0x3c   :  { %627 = vmatmul.msk.f32.gmra.mxu0 %vm140_vm0, %v35_v37 }
  0x3e   :  { %408 = vperm.xlu2 %656, %v358_v38  }
  0x42   :  { %398 = vperm.xlu1 %655, %v356_v39   ;;  %403 = vperm.xlu0 %654, %v357_v40  }
  0x44   :  { %628 = vmatmul.msk.f32.gmra.mxu0 %vm140_vm0, %v36_v41 }
  0x46   :  { %393 = vperm.xlu2 %656, %v355_v42  }
  0x4a   :  { %383 = vperm.xlu1 %655, %v353_v43   ;;  %388 = vperm.xlu0 %654, %v354_v44  }
  0x4c   :  { %629 = vmatmul.msk.f32.gmra.mxu0 %vm140_vm0, %v37_v45 }
  0x4e   :  { %378 = vperm.xlu2 %656, %v352_v46  }
  0x52   :  { %368 = vperm.xlu1 %655, %v350_v47   ;;  %373 = vperm.xlu0 %654, %v351_v48  }
  0x54   :  { %630 = vmatmul.msk.f32.gmra.mxu0 %vm140_vm0, %v38_v49 }
  0x60   :  { %v118_v4 = vpop.permute.xlu2 %117 }
  0x68   :  { %v113_v28 = vpop.permute.xlu2 %112 }
  0x70   :  { %v98_v38 = vpop.permute.xlu2 %97 }
  0x74   :  { %v138_v55 = vpop.permute.xlu0 %137  ;;  %v128_v57 = vpop.permute.xlu1 %127 }
  0x78   :  { %v83_v44 = vpop.permute.xlu2 %82 }
  0x7c   :  { %v133_v59 = vpop.permute.xlu0 %132  ;;  %v123_v0 = vpop.permute.xlu1 %122 }
  0x81   :  { %v925_v50 = vpop.f32.mrf.mxu0 }
  0x84   :  { %v108_v32 = vpop.permute.xlu0 %107  ;;  %v103_v36 = vpop.permute.xlu1 %102 }
  0x87   :  { %v239_v51 = vpop.f32.mrf.mxu2 }
  0x88   :  { %v240_v5 = vadd.f32 %v239_v51, %v118_v4 }
  0x89   :  { %v927_v52 = vpop.f32.mrf.mxu0 }
  0x8a   :  { %v265_v10 = vmul.f32 0.5, %v240_v5 }
  0x8c   :  { %v93_v39 = vpop.permute.xlu0 %92  ;;  %v88_v42 = vpop.permute.xlu1 %87 }
  0x8f   :  { %v242_v53 = vpop.f32.mrf.mxu2 }
  0x90   :  { %v243_v2 = vadd.f32 %v242_v53, %v123_v0 }
  0x91   :  { %v929_v54 = vpop.f32.mrf.mxu0 }
  0x92   :  { %v266_v6 = vmul.f32 0.5, %v243_v2 }
  0x94   :  { %v78_v47 = vpop.permute.xlu0 %77 }
  0x97   :  { %v245_v56 = vpop.f32.mrf.mxu2 }
  0x98   :  { %v246_v61 = vadd.f32 %v245_v56, %v128_v57 }
  0x99   :  { %v931_v58 = vpop.f32.mrf.mxu0 }
  0x9a   :  { %v267_v3 = vmul.f32 0.5, %v246_v61 }
  0x9c   :  { %v63_v4 = vpop.permute.xlu0 %62 }
  0x9f   :  { %v248_v60 = vpop.f32.mrf.mxu2 }
  0xa0   :  { %v249_v62 = vadd.f32 %v248_v60, %v133_v59 }
  0xa1   :  { %v933_v63 = vpop.f32.mrf.mxu0 }
  0xa2   :  { %v268_v1 = vmul.f32 0.5, %v249_v62  ;;  %v943_v57 = vadd.f32 %v933_v63, %v83_v44 }
  0xa4   :  { %657 = vtanh.f32 %v268_v1  ;;  %v68_v1 = vpop.permute.xlu2 %67  ;;  %v258_v63 = vmul.f32 0.5, %v943_v57 }
  0xa5   :  { %659 = vtanh.f32 %v267_v3 }
  0xa6   :  { %661 = vtanh.f32 %v266_v6  ;;  %v955_v6 = vadd.f32 %v927_v52, %v68_v1  ;;  %v339_v1 = vld [vmem:[%s1101_s3 + $0x28] sm:$0xff] }
  0xa7   :  { %v251_v7 = vpop.f32.mrf.mxu2 }
  0xa8   :  { %v252_v8 = vadd.f32 %v251_v7, %v138_v55 }
  0xa9   :  { %v221_v9 = vpop.f32.mrf.mxu0 }
  0xaa   :  { %v269_v11 = vmul.f32 0.5, %v252_v8  ;;  %v658_v12 = vpop.eup %657  ;;  %v940_v55 = vadd.f32 %v221_v9, %v88_v42 }
  0xab   :  { %v660_v13 = vpop.eup %659  ;;  %v300_v14 = vmul.f32 0.5, %v658_v12 }
  0xac   :  { %663 = vtanh.f32 %v269_v11  ;;  %v662_v15 = vpop.eup %661  ;;  %v299_v17 = vmul.f32 0.5, %v660_v13  ;;  %v259_v0 = vmul.f32 0.5, %v940_v55  ;;  %v960_v11 = vadd.f32 %v925_v50, %v63_v4  ;;  %v341_v4 = vld [vmem:[%s1101_s3 + $0x38] sm:$0xff] }
  0xad   :  { %665 = vtanh.f32 %v265_v10  ;;  %v316_v20 = vadd.f32 0.5, %v300_v14  ;;  %v298_v24 = vmul.f32 0.5, %v662_v15  ;;  %v255_v14 = vmul.f32 0.5, %v955_v6 }
  0xae   :  { %v315_v23 = vadd.f32 0.5, %v299_v17 }
  0xaf   :  { %v332_v26 = vmul.f32 %v316_v20, %v249_v62  ;;  %v314_v31 = vadd.f32 0.5, %v298_v24  ;;  %v947_v62 = vadd.f32 %v931_v58, %v78_v47 }
  0xb0   :  { %v331_v30 = vmul.f32 %v315_v23, %v246_v61  ;;  %v73_v61 = vpop.permute.xlu1 %72 }
  0xb1   :  { %v224_v16 = vpop.f32.mrf.mxu0  ;;  %v330_v34 = vmul.f32 %v314_v31, %v243_v2  ;;  %v951_v3 = vadd.f32 %v929_v54, %v73_v61  ;;  %v257_v7 = vmul.f32 0.5, %v947_v62  ;;  %v345_v61 = vld [vmem:[%s1101_s3 + $0x58] sm:$0xff] }
  0xb2   :  { %v664_v18 = vpop.eup %663  ;;  %v937_v48 = vadd.f32 %v224_v16, %v93_v39 }
  0xb3   :  { %v301_v19 = vmul.f32 0.5, %v664_v18  ;;  %v666_v21 = vpop.eup %665  ;;  %v256_v10 = vmul.f32 0.5, %v951_v3  ;;  %v254_v18 = vmul.f32 0.5, %v960_v11 }
  0xb4   :  { %v297_v27 = vmul.f32 0.5, %v666_v21  ;;  %v260_v59 = vmul.f32 0.5, %v937_v48 }
  0xb5   :  { %v317_v22 = vadd.f32 0.5, %v301_v19 }
  0xb6   :  { %v313_v33 = vadd.f32 0.5, %v297_v27 }
  0xb7   :  { %v333_v25 = vmul.f32 %v317_v22, %v252_v8 }
  0xb8   :  { %v329_v35 = vmul.f32 %v313_v33, %v240_v5 }
  0xb9   :  { %v227_v29 = vpop.f32.mrf.mxu0  ;;  %446 = vmatpush.msra.mxu1 %v333_v25  ;;  %637 = vmatpush.msra.mxu3 %v333_v25 }
  0xba   :  { %v935_v45 = vadd.f32 %v227_v29, %v98_v38 }
  0xbb   :  { %447 = vmatpush.msra.mxu1 %v332_v26  ;;  %638 = vmatpush.msra.mxu3 %v332_v26 }
  0xbc   :  { %v261_v51 = vmul.f32 0.5, %v935_v45 }
  0xbd   :  { %448 = vmatpush.msra.mxu1 %v331_v30  ;;  %639 = vmatpush.msra.mxu3 %v331_v30 }
  0xbf   :  { %449 = vmatpush.msra.mxu1 %v330_v34  ;;  %640 = vmatpush.msra.mxu3 %v330_v34 }
  0xc1   :  { %v230_v37 = vpop.f32.mrf.mxu0  ;;  %450 = vmatpush.msra.mxu1 %v329_v35  ;;  %641 = vmatpush.msra.mxu3 %v329_v35 }
  0xc2   :  { %v231_v43 = vadd.f32 %v230_v37, %v103_v36 }
  0xc4   :  { %v262_v49 = vmul.f32 0.5, %v231_v43 }
  0xc9   :  { %v233_v40 = vpop.f32.mrf.mxu0 }
  0xca   :  { %v234_v41 = vadd.f32 %v233_v40, %v108_v32 }
  0xcc   :  { %v263_v46 = vmul.f32 0.5, %v234_v41 }
  0xce   :  { %667 = vtanh.f32 %v263_v46 }
  0xcf   :  { %669 = vtanh.f32 %v262_v49 }
  0xd0   :  { %671 = vtanh.f32 %v261_v51  ;;  %v334_v51 = vld [vmem:[%s1101_s3] sm:$0xff] }
  0xd1   :  { %v236_v53 = vpop.f32.mrf.mxu0 }
  0xd2   :  { %v237_v56 = vadd.f32 %v236_v53, %v113_v28  ;;  %v342_v53 = vld [vmem:[%s1101_s3 + $0x40] sm:$0xff] }
  0xd4   :  { %v264_v60 = vmul.f32 0.5, %v237_v56  ;;  %v668_v2 = vpop.eup %667 }
  0xd5   :  { %v670_v5 = vpop.eup %669  ;;  %v295_v8 = vmul.f32 0.5, %v668_v2  ;;  %v347_v2 = vld [vmem:[%s1101_s3 + $0x68] sm:$0xff] }
  0xd6   :  { %673 = vtanh.f32 %v264_v60  ;;  %v672_v58 = vpop.eup %671  ;;  %v294_v12 = vmul.f32 0.5, %v670_v5  ;;  %v337_v60 = vld [vmem:[%s1101_s3 + $0x18] sm:$0xff] }
  0xd7   :  { %675 = vtanh.f32 %v260_v59  ;;  %v311_v15 = vadd.f32 0.5, %v295_v8  ;;  %v293_v16 = vmul.f32 0.5, %v672_v58  ;;  %v344_v59 = vld [vmem:[%s1101_s3 + $0x50] sm:$0xff]  ;;  %v349_v5 = vld [vmem:[%s1101_s3 + $0x78] sm:$0xff] }
  0xd8   :  { %677 = vtanh.f32 %v259_v0  ;;  %v310_v20 = vadd.f32 0.5, %v294_v12  ;;  %v346_v0 = vld [vmem:[%s1101_s3 + $0x60] sm:$0xff]  ;;  %v444_v12 = vpop.permute.xlu1 %443 }
  0xd9   :  { %679 = vtanh.f32 %v258_v63  ;;  %v327_v50 = vmul.f32 %v311_v15, %v234_v41  ;;  %v309_v23 = vadd.f32 0.5, %v293_v16  ;;  %v348_v63 = vld [vmem:[%s1101_s3 + $0x70] sm:$0xff]  ;;  %v434_v15 = vpop.permute.xlu0 %433 }
  0xda   :  { %681 = vtanh.f32 %v257_v7  ;;  %v326_v26 = vmul.f32 %v310_v20, %v231_v43 }
  0xdb   :  { %683 = vtanh.f32 %v256_v10  ;;  %v325_v30 = vmul.f32 %v309_v23, %v935_v45 }
  0xdc   :  { %v674_v9 = vpop.eup %673  ;;  %685 = vtanh.f32 %v255_v14  ;;  %v439_v14 = vpop.permute.xlu2 %438 }
  0xdd   :  { %v296_v54 = vmul.f32 0.5, %v674_v9  ;;  %v676_v13 = vpop.eup %675  ;;  %687 = vtanh.f32 %v254_v18 }
  0xde   :  { %v678_v17 = vpop.eup %677  ;;  %v292_v21 = vmul.f32 0.5, %v676_v13 }
  0xdf   :  { %v312_v52 = vadd.f32 0.5, %v296_v54  ;;  %v680_v22 = vpop.eup %679  ;;  %v291_v24 = vmul.f32 0.5, %v678_v17 }
  0xe0   :  { %v682_v25 = vpop.eup %681  ;;  %v308_v27 = vadd.f32 0.5, %v292_v21  ;;  %v290_v28 = vmul.f32 0.5, %v680_v22  ;;  %v429_v16 = vpop.permute.xlu1 %428 }
  0xe1   :  { %v328_v19 = vmul.f32 %v312_v52, %v237_v56  ;;  %v684_v29 = vpop.eup %683  ;;  %v307_v31 = vadd.f32 0.5, %v291_v24  ;;  %v289_v32 = vmul.f32 0.5, %v682_v25  ;;  %v343_v56 = vld [vmem:[%s1101_s3 + $0x48] sm:$0xff]  ;;  %v419_v20 = vpop.permute.xlu0 %418 }
  0xe2   :  { %v686_v33 = vpop.eup %685  ;;  %v324_v34 = vmul.f32 %v308_v27, %v937_v48  ;;  %v306_v35 = vadd.f32 0.5, %v290_v28  ;;  %v288_v36 = vmul.f32 0.5, %v684_v29 }
  0xe3   :  { %451 = vmatpush.msra.mxu1 %v328_v19  ;;  %642 = vmatpush.msra.mxu3 %v328_v19  ;;  %v688_v37 = vpop.eup %687  ;;  %v323_v38 = vmul.f32 %v307_v31, %v940_v55  ;;  %v305_v39 = vadd.f32 0.5, %v289_v32  ;;  %v287_v40 = vmul.f32 0.5, %v686_v33  ;;  %v335_v55 = vld [vmem:[%s1101_s3 + $0x8] sm:$0xff] }
  0xe4   :  { %v322_v41 = vmul.f32 %v306_v35, %v943_v57  ;;  %v304_v42 = vadd.f32 0.5, %v288_v36  ;;  %v286_v43 = vmul.f32 0.5, %v688_v37  ;;  %v336_v57 = vld [vmem:[%s1101_s3 + $0x10] sm:$0xff]  ;;  %v424_v19 = vpop.permute.xlu2 %423 }
  0xe5   :  { %452 = vmatpush.msra.mxu1 %v327_v50  ;;  %643 = vmatpush.msra.mxu3 %v327_v50  ;;  %v321_v44 = vmul.f32 %v305_v39, %v947_v62  ;;  %v303_v45 = vadd.f32 0.5, %v287_v40  ;;  %v338_v62 = vld [vmem:[%s1101_s3 + $0x20] sm:$0xff] }
  0xe6   :  { %v320_v46 = vmul.f32 %v304_v42, %v951_v3  ;;  %v302_v47 = vadd.f32 0.5, %v286_v43  ;;  %v340_v3 = vld [vmem:[%s1101_s3 + $0x30] sm:$0xff] }
  0xe7   :  { %453 = vmatpush.msra.mxu1 %v326_v26  ;;  %644 = vmatpush.msra.mxu3 %v326_v26  ;;  %v319_v48 = vmul.f32 %v303_v45, %v955_v6 }
  0xe8   :  { %v318_v49 = vmul.f32 %v302_v47, %v960_v11  ;;  %v414_v21 = vpop.permute.xlu1 %413 }
  0xe9   :  { %454 = vmatpush.msra.mxu1 %v325_v30  ;;  %645 = vmatpush.msra.mxu3 %v325_v30  ;;  %v404_v28 = vpop.permute.xlu0 %403 }
  0xeb   :  { %455 = vmatpush.msra.mxu1 %v324_v34  ;;  %646 = vmatpush.msra.mxu3 %v324_v34 }
  0xec   :  { %v409_v25 = vpop.permute.xlu2 %408 }
  0xed   :  { %456 = vmatpush.msra.mxu1 %v323_v38  ;;  %647 = vmatpush.msra.mxu3 %v323_v38 }
  0xef   :  { %457 = vmatpush.msra.mxu1 %v322_v41  ;;  %648 = vmatpush.msra.mxu3 %v322_v41 }
  0xf0   :  { %v399_v31 = vpop.permute.xlu1 %398 }
  0xf1   :  { %458 = vmatpush.msra.mxu1 %v321_v44  ;;  %649 = vmatpush.msra.mxu3 %v321_v44 }
  0xf3   :  { %459 = vmatpush.msra.mxu1 %v320_v46  ;;  %650 = vmatpush.msra.mxu3 %v320_v46  ;;  %v389_v46 = vpop.permute.xlu0 %388 }
  0xf4   :  { %v394_v42 = vpop.permute.xlu2 %393 }
  0xf5   :  { %460 = vmatpush.msra.mxu1 %v319_v48  ;;  %651 = vmatpush.msra.mxu3 %v319_v48 }
  0xf7   :  { %461 = vmatpush.msra.mxu1 %v318_v49  ;;  %652 = vmatpush.msra.mxu3 %v318_v49 }
  0xf8   :  { %462 = vmatmul.f32.vlgmr.msra.gmra.mxu1 %v334_v51  ;;  %486 = vmatmul.f32.vlgmr.msra.gmra.mxu3 %v342_v53  ;;  %v384_v53 = vpop.permute.xlu1 %383 }
 0x100   :  { %465 = vmatmul.f32.gmra.mxu1 %v335_v55  ;;  %489 = vmatmul.f32.gmra.mxu3 %v343_v56 }
 0x108   :  { %468 = vmatmul.f32.gmra.mxu1 %v336_v57  ;;  %492 = vmatmul.f32.gmra.mxu3 %v344_v59 }
 0x110   :  { %471 = vmatmul.f32.gmra.mxu1 %v337_v60  ;;  %495 = vmatmul.f32.gmra.mxu3 %v345_v61 }
 0x118   :  { %474 = vmatmul.f32.gmra.mxu1 %v338_v62  ;;  %498 = vmatmul.f32.gmra.mxu3 %v346_v0 }
 0x120   :  { %477 = vmatmul.f32.gmra.mxu1 %v339_v1  ;;  %501 = vmatmul.f32.gmra.mxu3 %v347_v2 }
 0x128   :  { %480 = vmatmul.f32.gmra.mxu1 %v340_v3  ;;  %504 = vmatmul.f32.gmra.mxu3 %v348_v63 }
 0x130   :  { %483 = vmatmul.f32.gmra.mxu1 %v341_v4  ;;  %507 = vmatmul.f32.gmra.mxu3 %v349_v5 }
 0x175   :  { %v1020_v6 = vpop.f32.mrf.mxu1 }
 0x17b   :  { %v487_v7 = vpop.f32.mrf.mxu3 }
 0x17c   :  { %v1044_v40 = vadd.f32 %v487_v7, %v409_v25 }
 0x17d   :  { %v1022_v58 = vpop.f32.mrf.mxu1 }
 0x17e   :  { %v519_v48 = vmul.f32 0.5, %v1044_v40 }
 0x183   :  { %v490_v8 = vpop.f32.mrf.mxu3 }
 0x184   :  { %v1041_v36 = vadd.f32 %v490_v8, %v414_v21  ;;  %v379_v8 = vpop.permute.xlu2 %378  ;;  %v369_v21 = vpop.permute.xlu1 %368 }
 0x185   :  { %v1024_v9 = vpop.f32.mrf.mxu1 }
 0x186   :  { %v520_v44 = vmul.f32 0.5, %v1041_v36 }
 0x18b   :  { %v493_v10 = vpop.f32.mrf.mxu3 }
 0x18c   :  { %v1039_v34 = vadd.f32 %v493_v10, %v419_v20 }
 0x18d   :  { %v1026_v11 = vpop.f32.mrf.mxu1 }
 0x18e   :  { %v521_v41 = vmul.f32 0.5, %v1039_v34  ;;  %v1060_v5 = vadd.f32 %v1026_v11, %v384_v53 }
 0x190   :  { %v514_v20 = vmul.f32 0.5, %v1060_v5 }
 0x193   :  { %v496_v54 = vpop.f32.mrf.mxu3 }
 0x194   :  { %v1035_v29 = vadd.f32 %v496_v54, %v424_v19 }
 0x195   :  { %v475_v13 = vpop.f32.mrf.mxu1 }
 0x196   :  { %v522_v37 = vmul.f32 0.5, %v1035_v29  ;;  %v1056_v0 = vadd.f32 %v475_v13, %v389_v46  ;;  %v1064_v13 = vadd.f32 %v1024_v9, %v379_v8 }
 0x19b   :  { %v499_v52 = vpop.f32.mrf.mxu3 }
 0x19c   :  { %v1032_v26 = vadd.f32 %v499_v52, %v429_v16  ;;  %v515_v52 = vmul.f32 0.5, %v1056_v0 }
 0x19d   :  { %v478_v17 = vpop.f32.mrf.mxu1 }
 0x19e   :  { %v523_v32 = vmul.f32 0.5, %v1032_v26  ;;  %v1053_v57 = vadd.f32 %v478_v17, %v394_v42 }
 0x1a0   :  { %v516_v7 = vmul.f32 0.5, %v1053_v57 }
 0x1a3   :  { %v502_v18 = vpop.f32.mrf.mxu3 }
 0x1a4   :  { %v1030_v24 = vadd.f32 %v502_v18, %v434_v15  ;;  %v374_v15 = vpop.permute.xlu0 %373 }
 0x1a5   :  { %v481_v23 = vpop.f32.mrf.mxu1  ;;  %v1069_v19 = vadd.f32 %v1022_v58, %v374_v15 }
 0x1a6   :  { %v524_v30 = vmul.f32 0.5, %v1030_v24  ;;  %v1051_v49 = vadd.f32 %v481_v23, %v399_v31 }
 0x1a8   :  { %v517_v1 = vmul.f32 0.5, %v1051_v49 }
 0x1ab   :  { %v505_v22 = vpop.f32.mrf.mxu3 }
 0x1ac   :  { %v1028_v50 = vadd.f32 %v505_v22, %v439_v14 }
 0x1ad   :  { %v484_v39 = vpop.f32.mrf.mxu1 }
 0x1ae   :  { %v525_v27 = vmul.f32 0.5, %v1028_v50  ;;  %v1048_v45 = vadd.f32 %v484_v39, %v404_v28 }
 0x1b0   :  { %689 = vtanh.f32 %v525_v27  ;;  %v518_v59 = vmul.f32 0.5, %v1048_v45  ;;  %v464_v27 = vadd.f32 %v1020_v6, %v369_v21 }
 0x1b1   :  { %691 = vtanh.f32 %v524_v30 }
 0x1b2   :  { %693 = vtanh.f32 %v523_v32  ;;  %v512_v32 = vmul.f32 0.5, %v1069_v19 }
 0x1b3   :  { %v508_v33 = vpop.f32.mrf.mxu3 }
 0x1b4   :  { %v509_v35 = vadd.f32 %v508_v33, %v444_v12 }
 0x1b6   :  { %v526_v38 = vmul.f32 0.5, %v509_v35  ;;  %v690_v43 = vpop.eup %689 }
 0x1b7   :  { %v692_v47 = vpop.eup %691  ;;  %v557_v55 = vmul.f32 0.5, %v690_v43 }
 0x1b8   :  { %695 = vtanh.f32 %v526_v38  ;;  %v694_v51 = vpop.eup %693  ;;  %v556_v61 = vmul.f32 0.5, %v692_v47  ;;  %v511_v38 = vmul.f32 0.5, %v464_v27 }
 0x1b9   :  { %697 = vtanh.f32 %v522_v37  ;;  %v573_v3 = vadd.f32 0.5, %v557_v55  ;;  %v555_v63 = vmul.f32 0.5, %v694_v51 }
 0x1ba   :  { %699 = vtanh.f32 %v521_v41  ;;  %v572_v54 = vadd.f32 0.5, %v556_v61 }
 0x1bb   :  { %701 = vtanh.f32 %v520_v44  ;;  %v589_v16 = vmul.f32 %v573_v3, %v1028_v50  ;;  %v571_v11 = vadd.f32 0.5, %v555_v63  ;;  %v513_v50 = vmul.f32 0.5, %v1064_v13 }
 0x1bc   :  { %703 = vtanh.f32 %v519_v48  ;;  %v588_v9 = vmul.f32 %v572_v54, %v1030_v24 }
 0x1bd   :  { %705 = vtanh.f32 %v518_v59  ;;  %v587_v28 = vmul.f32 %v571_v11, %v1032_v26 }
 0x1be   :  { %v696_v56 = vpop.eup %695  ;;  %707 = vtanh.f32 %v517_v1 }
 0x1bf   :  { %v558_v60 = vmul.f32 0.5, %v696_v56  ;;  %v698_v62 = vpop.eup %697  ;;  %709 = vtanh.f32 %v516_v7 }
 0x1c0   :  { %v700_v4 = vpop.eup %699  ;;  %v554_v12 = vmul.f32 0.5, %v698_v62  ;;  %711 = vtanh.f32 %v515_v52 }
 0x1c1   :  { %v574_v2 = vadd.f32 0.5, %v558_v60  ;;  %v702_v14 = vpop.eup %701  ;;  %v553_v17 = vmul.f32 0.5, %v700_v4  ;;  %713 = vtanh.f32 %v514_v20 }
 0x1c2   :  { %v704_v18 = vpop.eup %703  ;;  %v570_v22 = vadd.f32 0.5, %v554_v12  ;;  %v552_v23 = vmul.f32 0.5, %v702_v14  ;;  %715 = vtanh.f32 %v513_v50 }
 0x1c3   :  { %v590_v10 = vmul.f32 %v574_v2, %v509_v35  ;;  %v706_v25 = vpop.eup %705  ;;  %v569_v58 = vadd.f32 0.5, %v553_v17  ;;  %v551_v30 = vmul.f32 0.5, %v704_v18  ;;  %717 = vtanh.f32 %v512_v32 }
 0x1c4   :  { %v708_v31 = vpop.eup %707  ;;  %v586_v24 = vmul.f32 %v570_v22, %v1035_v29  ;;  %v568_v33 = vadd.f32 0.5, %v552_v23  ;;  %v550_v35 = vmul.f32 0.5, %v706_v25  ;;  %719 = vtanh.f32 %v511_v38 }
 0x1c5   :  { %592 = vmatpush.msrb.mxu2 %v590_v10  ;;  %v710_v37 = vpop.eup %709  ;;  %v585_v6 = vmul.f32 %v569_v58, %v1039_v34  ;;  %v567_v39 = vadd.f32 0.5, %v551_v30  ;;  %v549_v41 = vmul.f32 0.5, %v708_v31  ;;  %v591_v10 = vld [vmem:[%s1102_s5] sm:$0xff] }
 0x1c6   :  { %v712_v26 = vpop.eup %711  ;;  %v584_v42 = vmul.f32 %v568_v33, %v1041_v36  ;;  %v566_v43 = vadd.f32 0.5, %v550_v35  ;;  %v548_v44 = vmul.f32 0.5, %v710_v37 }
 0x1c7   :  { %593 = vmatpush.msrb.mxu2 %v589_v16  ;;  %v714_v46 = vpop.eup %713  ;;  %v583_v29 = vmul.f32 %v567_v39, %v1044_v40  ;;  %v565_v47 = vadd.f32 0.5, %v549_v41  ;;  %v547_v48 = vmul.f32 0.5, %v712_v26 }
 0x1c8   :  { %v716_v51 = vpop.eup %715  ;;  %v582_v34 = vmul.f32 %v566_v43, %v1048_v45  ;;  %v564_v53 = vadd.f32 0.5, %v548_v44  ;;  %v546_v55 = vmul.f32 0.5, %v714_v46 }
 0x1c9   :  { %594 = vmatpush.msrb.mxu2 %v588_v9  ;;  %v718_v56 = vpop.eup %717  ;;  %v581_v59 = vmul.f32 %v565_v47, %v1051_v49  ;;  %v563_v36 = vadd.f32 0.5, %v547_v48  ;;  %v545_v60 = vmul.f32 0.5, %v716_v51 }
 0x1ca   :  { %v720_v61 = vpop.eup %719  ;;  %v580_v62 = vmul.f32 %v564_v53, %v1053_v57  ;;  %v562_v1 = vadd.f32 0.5, %v546_v55  ;;  %v544_v40 = vmul.f32 0.5, %v718_v56 }
 0x1cb   :  { %595 = vmatpush.msrb.mxu2 %v587_v28  ;;  %v579_v2 = vmul.f32 %v563_v36, %v1056_v0  ;;  %v561_v3 = vadd.f32 0.5, %v545_v60  ;;  %v543_v63 = vmul.f32 0.5, %v720_v61  ;;  %v613_v0 = vstv %s1103_s6 }
 0x1cc   :  { %v578_v45 = vmul.f32 %v562_v1, %v1060_v5  ;;  %v560_v4 = vadd.f32 0.5, %v544_v40 }
 0x1cd   :  { %596 = vmatpush.msrb.mxu2 %v586_v24  ;;  %v577_v49 = vmul.f32 %v561_v3, %v1064_v13  ;;  %v559_v7 = vadd.f32 0.5, %v543_v63 }
 0x1ce   :  { %v576_v8 = vmul.f32 %v560_v4, %v1069_v19 }
 0x1cf   :  { %597 = vmatpush.msrb.mxu2 %v585_v6  ;;  %v575_v57 = vmul.f32 %v559_v7, %v464_v27 }
 0x1d1   :  { %598 = vmatpush.msrb.mxu2 %v584_v42 }
 0x1d3   :  { %599 = vmatpush.msrb.mxu2 %v583_v29 }
 0x1d5   :  { %600 = vmatpush.msrb.mxu2 %v582_v34 }
 0x1d7   :  { %601 = vmatpush.msrb.mxu2 %v581_v59 }
 0x1d9   :  { %602 = vmatpush.msrb.mxu2 %v580_v62 }
 0x1db   :  { %603 = vmatpush.msrb.mxu2 %v579_v2 }
 0x1dd   :  { %604 = vmatpush.msrb.mxu2 %v578_v45 }
 0x1df   :  { %605 = vmatpush.msrb.mxu2 %v577_v49 }
 0x1e1   :  { %606 = vmatpush.msrb.mxu2 %v576_v8 }
 0x1e3   :  { %607 = vmatpush.msrb.mxu2 %v575_v57 }
 0x1e4   :  { %608 = vmatmul.f32.vlgmr.msrb.gmra.mxu2 %v591_v10 }
 0x267   :  { %v609_v5 = vpop.f32.mrf.mxu2 }
 0x268   :  { %v614_v54 = vadd.f32 %v613_v0, %v609_v5 }
 0x26a   :  { %615 = vst [vmem:[%s1104_s7] sm:$0x1] %v614_v54 }

</bundles_post_ra>
